<compile_context>
chip_gen: v5e
topology: v5e:2x2
jax: 0.10.0
libtpu: 0.0.40
codegen_flags: <defaults>
</compile_context>

<pallas_src>
import jax
import jax.numpy as jnp
from jax.experimental import pallas as pl
from jax.experimental.pallas import tpu as pltpu


H1 = 128   # fc1 output width
H2 = 64    # fc2 real output width
H3 = 1     # fc3 real output width
H2P = 128  # fc2 width padded to a full lane tile (pad cols are exactly 0)


def _mlp_kernel(x_ref, w1_ref, b1_ref, w2_ref, b2_ref, w3_ref, b3_ref, o_ref):
    # fc1 + relu: bf16 MXU operands (x cast in-kernel), f32 accumulate, f32 VPU.
    x = x_ref[...].astype(jnp.bfloat16)
    h1 = jnp.dot(x, w1_ref[...], preferred_element_type=jnp.float32)
    h1 = jnp.maximum(h1 + b1_ref[...], 0.0)

    # fc2 + relu (padded to 128 lanes; padded columns stay exactly 0 after relu).
    h2 = jnp.dot(h1.astype(jnp.bfloat16), w2_ref[...],
                 preferred_element_type=jnp.float32)
    h2 = jnp.maximum(h2 + b2_ref[...], 0.0)

    # fc3 as VPU multiply + XLU lane reduction (w3 is a zero-padded [1,128] f32
    # row); cheaper than a padded MXU pass and keeps the output a single
    # lane-dense [1, tm] row per tile (unmasked full-width store).
    o = jnp.sum(h2 * w3_ref[...], axis=-1)                      # (tm,)
    o_ref[...] = (o.reshape(1, -1) + b3_ref[...]).astype(o_ref.dtype)

    # TODO(synk): nn.Dropout (isdrop=1 training path) not implemented; default
    # isdrop=0 (and eval-mode dropout is identity). Would need
    # pltpu.prng_seed / pltpu.prng_random_bits inside the kernel.


def _round_up(n, m):
    return ((n + m - 1) // m) * m


def _choose_tile(B, size):
    """Batch tile (rows per grid step).

    Small batches: a single block rounded up to a multiple of 8.
    Large batches: a multiple of 128 (legal lane-dense output block), giving
    >=4 grid steps (megacore + pipelining), capped at 1024 rows and capped so
    the double-buffered f32 x tile stays ~<=16 MiB of VMEM.
    """
    if B <= 256:
        return _round_up(max(B, 8), 8)
    cap_vmem = max(128, (((16 * 2**20) // (2 * 4 * size)) // 128) * 128)
    tgt = _round_up(pl.cdiv(B, 4), 128)
    return int(max(128, min(1024, cap_vmem, tgt)))


def _pad2(a, rows, cols):
    r, c = a.shape
    return jnp.pad(a, ((0, rows - r), (0, cols - c)))


def prepare_params(params):
    """One-time layout prep (do NOT run per forward call).

    w1/w2 cast to bf16 (MXU operands), fc2 padded 64->128 lanes, fc3 weight
    turned into a zero-padded [1,128] f32 row, biases kept f32.
    """
    w1, b1, w2, b2, w3, b3 = params
    w1p = w1.astype(jnp.bfloat16)                          # (size, 128)
    w2p = _pad2(w2, H1, H2P).astype(jnp.bfloat16)          # (128, 128), cols 64.. = 0
    b2p = _pad2(b2, 1, H2P)                                # (1, 128)
    w3p = _pad2(w3.reshape(H2, H3).T, 1, H2P)              # (1, 128) f32 row, pads = 0
    b3p = b3.reshape(1, 1)                                 # (1, 1)
    return (w1p, b1, w2p, b2p, w3p, b3p)


def cnn_hybrid_forward(x, prepped):
    """Fused forward pass of CNN_hybrid (isdrop=0). Returns [B, 1] float32."""
    w1, b1, w2, b2, w3_row, b3 = prepped
    B, size = x.shape

    tm = _choose_tile(B, size)
    Bp = _round_up(B, tm)
    if Bp != B:
        x = jnp.pad(x, ((0, Bp - B), (0, 0)))   # padded rows are discarded below
    grid = (Bp // tm,)

    const = lambda shape: pl.BlockSpec(shape, lambda i: (0, 0))

    # VMEM budget: double-buffered f32 x tile + resident weights + output rows.
    resident = 2 * (size * H1 * 2 + H1 * H2P * 2 + (H1 + 2 * H2P + 1) * 4)
    needed = 2 * tm * size * 4 + 2 * tm * 4 + resident + (4 << 20)
    vmem_limit = int(min(max(needed, 16 << 20), 48 << 20))

    out = pl.pallas_call(
        _mlp_kernel,
        out_shape=jax.ShapeDtypeStruct((1, Bp), jnp.float32),
        grid=grid,
        in_specs=[
            pl.BlockSpec((tm, size), lambda i: (i, 0)),   # x streams over batch
            const((size, H1)), const((1, H1)),            # weights resident in VMEM
            const((H1, H2P)), const((1, H2P)),
            const((1, H2P)), const((1, 1)),
        ],
        out_specs=pl.BlockSpec((1, tm), lambda i: (0, i)),  # lane-dense over batch
        compiler_params=pltpu.CompilerParams(
            dimension_semantics=("parallel",),             # shard batch across TCs (v7x)
            vmem_limit_bytes=vmem_limit,
        ),
        cost_estimate=pl.CostEstimate(
            flops=2 * Bp * (size * H1 + H1 * H2P) + 3 * Bp * H2P,
            transcendentals=0,
            bytes_accessed=(Bp * size * 4                  # x (f32 in)
                            + size * H1 * 2 + H1 * H2P * 2 # bf16 weights
                            + (H1 + 2 * H2P + 1) * 4       # biases + w3 row
                            + Bp * 4),                     # slim f32 output
        ),
    )(x, w1, b1, w2, b2, w3_row, b3)

    return out.reshape(-1)[:B].reshape(B, H3)


def init_params(key, size):
    """Deterministic init mimicking nn.Linear's U(-1/sqrt(fan_in), 1/sqrt(fan_in)).

    Weights stored already transposed: [in_features, out_features] (f32).
    Biases stored as [1, out_features].
    """
    dims = [(size, H1), (H1, H2), (H2, H3)]
    params = []
    for (fan_in, fan_out) in dims:
        key, kw, kb = jax.random.split(key, 3)
        bound = 1.0 / jnp.sqrt(float(fan_in))
        w = jax.random.uniform(kw, (fan_in, fan_out), jnp.float32, -bound, bound)
        b = jax.random.uniform(kb, (1, fan_out), jnp.float32, -bound, bound)
        params += [w, b]
    return tuple(params)


def reference_forward_bf16(x, params):
    """Mirrors the kernel's numerics: bf16 MXU fc1/fc2, f32 fc3 reduce."""
    w1, b1, w2, b2, w3, b3 = params
    bf = jnp.bfloat16
    h1 = jnp.maximum(
        jnp.dot(x.astype(bf), w1.astype(bf), preferred_element_type=jnp.float32) + b1, 0.0)
    h2 = jnp.maximum(
        jnp.dot(h1.astype(bf), w2.astype(bf), preferred_element_type=jnp.float32) + b2, 0.0)
    return h2 @ w3 + b3


def reference_forward_f32(x, params):
    """Pure f32 reference (matches the original PyTorch module)."""
    w1, b1, w2, b2, w3, b3 = params
    h1 = jnp.maximum(x @ w1 + b1, 0.0)
    h2 = jnp.maximum(h1 @ w2 + b2, 0.0)
    return h2 @ w3 + b3


if __name__ == "__main__":
    key = jax.random.PRNGKey(0)
    B, size = 8, 32  # small shapes: batch=8, input feature size=32

    key, kx = jax.random.split(key)
    x = jax.random.normal(kx, (B, size), jnp.float32)
    params = init_params(key, size)
    prepped = prepare_params(params)   # one-time pad/cast, not per forward

    out = cnn_hybrid_forward(x, prepped)
    out = jax.block_until_ready(out)
    assert out.shape == (B, H3), out.shape

    # Tight check vs. a reference that uses the same bf16-in / f32-accumulate math.
    ref_bf = reference_forward_bf16(x, params)
    assert jnp.allclose(out, ref_bf, atol=1e-3, rtol=1e-3), (
        f"max abs err vs bf16 ref: {jnp.max(jnp.abs(out - ref_bf))}")

    # Loose sanity check vs. the exact f32 (PyTorch-equivalent) forward.
    ref_f32 = reference_forward_f32(x, params)
    assert jnp.allclose(out, ref_f32, atol=5e-2, rtol=5e-2), (
        f"max abs err vs f32 ref: {jnp.max(jnp.abs(out - ref_f32))}")

    print("KERNEL_OK")
</pallas_src>

<mosaic_0001>
module attributes {stable_mosaic.version = 11 : i64} {
  func.func @_mlp_kernel(%arg0: i32, %arg1: memref<8x32xf32, #tpu.memory_space<vmem>>, %arg2: memref<32x128xbf16, #tpu.memory_space<vmem>>, %arg3: memref<1x128xf32, #tpu.memory_space<vmem>>, %arg4: memref<128x128xbf16, #tpu.memory_space<vmem>>, %arg5: memref<1x128xf32, #tpu.memory_space<vmem>>, %arg6: memref<1x128xf32, #tpu.memory_space<vmem>>, %arg7: memref<1x1xf32, #tpu.memory_space<vmem>>, %arg8: memref<1x8xf32, #tpu.memory_space<vmem>>) attributes {dimension_semantics = [#tpu.dimension_semantics<parallel>], iteration_bounds = array<i64: 1>, scalar_prefetch = 0 : i64, scratch_operands = 0 : i64, tpu.core_type = #tpu.core_type<tc>, window_params = [{transform_indices = @transform_0, window_bounds = array<i64: 8, 32>}, {pipeline_mode = #tpu.pipeline_mode<synchronous>, transform_indices = @transform_1, window_bounds = array<i64: 32, 128>}, {pipeline_mode = #tpu.pipeline_mode<synchronous>, transform_indices = @transform_2, window_bounds = array<i64: 1, 128>}, {pipeline_mode = #tpu.pipeline_mode<synchronous>, transform_indices = @transform_3, window_bounds = array<i64: 128, 128>}, {pipeline_mode = #tpu.pipeline_mode<synchronous>, transform_indices = @transform_4, window_bounds = array<i64: 1, 128>}, {pipeline_mode = #tpu.pipeline_mode<synchronous>, transform_indices = @transform_5, window_bounds = array<i64: 1, 128>}, {pipeline_mode = #tpu.pipeline_mode<synchronous>, transform_indices = @transform_6, window_bounds = array<i64: 1, 1>}, {transform_indices = @transform_7, window_bounds = array<i64: 1, 8>}]} {
    %c0 = arith.constant 0 : index
    %c0_0 = arith.constant 0 : index
    %0 = vector.load %arg1[%c0, %c0_0] : memref<8x32xf32, #tpu.memory_space<vmem>>, vector<8x32xf32>
    %1 = arith.truncf %0 : vector<8x32xf32> to vector<8x32xbf16>
    %c0_1 = arith.constant 0 : index
    %c0_2 = arith.constant 0 : index
    %2 = vector.load %arg2[%c0_1, %c0_2] : memref<32x128xbf16, #tpu.memory_space<vmem>>, vector<32x128xbf16>
    %cst = arith.constant dense<0.000000e+00> : vector<8x128xf32>
    %3 = tpu.matmul %1, %2, %cst {dimension_numbers = #tpu.dot_dimension_numbers<[1], [0], [0], [1], [0, 0, 1, 1], [], []>} : vector<8x32xbf16>, vector<32x128xbf16>, vector<8x128xf32> -> vector<8x128xf32>
    %c0_3 = arith.constant 0 : index
    %c0_4 = arith.constant 0 : index
    %4 = vector.load %arg3[%c0_3, %c0_4] : memref<1x128xf32, #tpu.memory_space<vmem>>, vector<1x128xf32>
    %5 = vector.broadcast %4 : vector<1x128xf32> to vector<8x128xf32>
    %6 = arith.addf %3, %5 : vector<8x128xf32>
    %cst_5 = arith.constant 0.000000e+00 : f32
    %7 = vector.broadcast %cst_5 : f32 to vector<8x128xf32>
    %8 = arith.maximumf %6, %7 : vector<8x128xf32>
    %9 = arith.truncf %8 : vector<8x128xf32> to vector<8x128xbf16>
    %c0_6 = arith.constant 0 : index
    %c0_7 = arith.constant 0 : index
    %10 = vector.load %arg4[%c0_6, %c0_7] : memref<128x128xbf16, #tpu.memory_space<vmem>>, vector<128x128xbf16>
    %cst_8 = arith.constant dense<0.000000e+00> : vector<8x128xf32>
    %11 = tpu.matmul %9, %10, %cst_8 {dimension_numbers = #tpu.dot_dimension_numbers<[1], [0], [0], [1], [0, 0, 1, 1], [], []>} : vector<8x128xbf16>, vector<128x128xbf16>, vector<8x128xf32> -> vector<8x128xf32>
    %c0_9 = arith.constant 0 : index
    %c0_10 = arith.constant 0 : index
    %12 = vector.load %arg5[%c0_9, %c0_10] : memref<1x128xf32, #tpu.memory_space<vmem>>, vector<1x128xf32>
    %13 = vector.broadcast %12 : vector<1x128xf32> to vector<8x128xf32>
    %14 = arith.addf %11, %13 : vector<8x128xf32>
    %cst_11 = arith.constant 0.000000e+00 : f32
    %15 = vector.broadcast %cst_11 : f32 to vector<8x128xf32>
    %16 = arith.maximumf %14, %15 : vector<8x128xf32>
    %c0_12 = arith.constant 0 : index
    %c0_13 = arith.constant 0 : index
    %17 = vector.load %arg6[%c0_12, %c0_13] : memref<1x128xf32, #tpu.memory_space<vmem>>, vector<1x128xf32>
    %18 = vector.broadcast %17 : vector<1x128xf32> to vector<8x128xf32>
    %19 = arith.mulf %16, %18 : vector<8x128xf32>
    %cst_14 = arith.constant dense<0.000000e+00> : vector<8xf32>
    %20 = vector.multi_reduction <add>, %19, %cst_14 [1] : vector<8x128xf32> to vector<8xf32>
    %21 = vector.shape_cast %20 : vector<8xf32> to vector<1x8xf32>
    %c0_15 = arith.constant 0 : index
    %c0_16 = arith.constant 0 : index
    %22 = vector.load %arg7[%c0_15, %c0_16] : memref<1x1xf32, #tpu.memory_space<vmem>>, vector<1x1xf32>
    %23 = vector.broadcast %22 : vector<1x1xf32> to vector<1x8xf32>
    %24 = arith.addf %21, %23 : vector<1x8xf32>
    %c0_17 = arith.constant 0 : index
    %c0_18 = arith.constant 0 : index
    %25 = vector.load %arg8[%c0_17, %c0_18] : memref<1x8xf32, #tpu.memory_space<vmem>>, vector<1x8xf32>
    tpu.vector_store %arg8[%c0_17, %c0_18], %24 {strides = array<i32>} : memref<1x8xf32, #tpu.memory_space<vmem>>, vector<1x8xf32>,
    return
  }
  func.func @transform_0(%arg0: i32) -> (i32, i32) {
    %c0_i32 = arith.constant 0 : i32
    %c0_i32_0 = arith.constant 0 : i32
    return %arg0, %c0_i32 : i32, i32
  }
  func.func @transform_1(%arg0: i32) -> (i32, i32) {
    %c0_i32 = arith.constant 0 : i32
    %c0_i32_0 = arith.constant 0 : i32
    %c0_i32_1 = arith.constant 0 : i32
    return %c0_i32, %c0_i32_0 : i32, i32
  }
  func.func @transform_2(%arg0: i32) -> (i32, i32) {
    %c0_i32 = arith.constant 0 : i32
    %c0_i32_0 = arith.constant 0 : i32
    %c0_i32_1 = arith.constant 0 : i32
    return %c0_i32, %c0_i32_0 : i32, i32
  }
  func.func @transform_3(%arg0: i32) -> (i32, i32) {
    %c0_i32 = arith.constant 0 : i32
    %c0_i32_0 = arith.constant 0 : i32
    %c0_i32_1 = arith.constant 0 : i32
    return %c0_i32, %c0_i32_0 : i32, i32
  }
  func.func @transform_4(%arg0: i32) -> (i32, i32) {
    %c0_i32 = arith.constant 0 : i32
    %c0_i32_0 = arith.constant 0 : i32
    %c0_i32_1 = arith.constant 0 : i32
    return %c0_i32, %c0_i32_0 : i32, i32
  }
  func.func @transform_5(%arg0: i32) -> (i32, i32) {
    %c0_i32 = arith.constant 0 : i32
    %c0_i32_0 = arith.constant 0 : i32
    %c0_i32_1 = arith.constant 0 : i32
    return %c0_i32, %c0_i32_0 : i32, i32
  }
  func.func @transform_6(%arg0: i32) -> (i32, i32) {
    %c0_i32 = arith.constant 0 : i32
    %c0_i32_0 = arith.constant 0 : i32
    %c0_i32_1 = arith.constant 0 : i32
    return %c0_i32, %c0_i32_0 : i32, i32
  }
  func.func @transform_7(%arg0: i32) -> (i32, i32) {
    %c0_i32 = arith.constant 0 : i32
    %c0_i32_0 = arith.constant 0 : i32
    return %c0_i32, %arg0 : i32, i32
  }
}

</mosaic_0001>

<bundles_post_ra>
// kernel: tpu_custom_call.1
= control target key start
LH: loop header
LB: loop body
LE: loop exit
PB: predicated region body
PF: predicated region fallthrough
CT: control target
= control target key end

     0   :  { %s473_s0 = inlined_call_operand.hbm [shape: f32[8,32], index: 0, kind: input, shape index: {}]   ;;  %s474_s1 = inlined_call_operand.hbm [shape: bf16[32,128], index: 1, kind: input, shape index: {}]   ;;  %s475_s2 = inlined_call_operand.vmem [shape: f32[1,128], index: 2, kind: input, shape index: {}]   ;;  %s476_s3 = inlined_call_operand.hbm [shape: bf16[128,128], index: 3, kind: input, shape index: {}]   ;;  %s477_s4 = inlined_call_operand.vmem [shape: f32[1,128], index: 4, kind: input, shape index: {}]   ;;  %s478_s5 = inlined_call_operand.vmem [shape: f32[1,128], index: 5, kind: input, shape index: {}]   ;;  %s479_s6 = inlined_call_operand.<no memory space> [shape: f32[1,1], index: 6, kind: input, shape index: {}]   ;;  %s480_s7 = inlined_call_operand.hbm [shape: f32[1,8], index: 7, kind: output, shape index: {}]  }
   0x1   :  { %v12_v0 = vstv %s479_s6 }
   0x2   :  { %13 = vst [vmem:[#allocation2] sm:$0x1] %v12_v0 }
   0x3   :  { %14 = vsyncpa [#allocation4], 0 }
   0x4   :  { %15 = vsyncpa [#allocation7], 0  ;;  %s32_s28 = sshll.u32 %s474_s1, 4  ;;  %s33_s28 = int_to_ptr.hbm [resolvable:$true] %s32_s28 }
   0x5   :  { %16 = vsyncpa [#allocation5], 0  ;;  %s402_s29 = smov [#allocation6]   ;;  %s22_s10 = sshll.u32 %s473_s0, 4  ;;  %s23_s10 = int_to_ptr.hbm [resolvable:$true] %s22_s10 }
   0x6   :  { %s34_s30 = sshll.u32 %s402_s29, 4  ;;  %s403_s11 = smov 64   ;;  %s35_s30 = int_to_ptr.vmem [resolvable:$true] %s34_s30 }
   0x7   :  { %s404_s12 = smov 4   ;;  %s405_s6 = smov [#allocation3]  }
   0x8   :  { %40 = dma.hbm_to_vmem [thread:$0]  %s33_s28, 256, %s35_s30, [#allocation7], %s403_s11, %s403_s11, %s404_s12  }
   0x9   :  { %s24_s13 = sshll.u32 %s405_s6, 4  ;;  %s47_s16 = sshll.u32 %s476_s3, 4  ;;  %s25_s13 = int_to_ptr.vmem [resolvable:$true] %s24_s13  ;;  %s48_s16 = int_to_ptr.hbm [resolvable:$true] %s47_s16 }
   0xa   :  { %27 = dma.hbm_to_vmem [thread:$0]  %s23_s10, 128, %s25_s13, [#allocation4]  }
   0xb   :  { %s406_s1 = smov [#allocation8]  }
   0xc   :  { %s49_s17 = sshll.u32 %s406_s1, 4  ;;  %s50_s17 = int_to_ptr.vmem [resolvable:$true] %s49_s17 }
   0xd   :  { %55 = dma.hbm_to_vmem [thread:$0]  %s48_s16, 1024, %s50_s17, [#allocation7], %s403_s11, %s403_s11, %s404_s12  }
   0xe   :  { %396 = dma.done.wait [#allocation4], 128  }
   0xf   :  { %397 = vsyncadd [#allocation4], 4294967168 }
  0x10   :  { %398 = dma.done.wait [#allocation7], 1280  }
  0x11   :  { %399 = vsyncadd [#allocation7], 4294966016  ;;  %v280_v1 = vld [vmem:[#allocation6 + $0x8] sm:$0xff]  ;;  %v279_v3 = vld [vmem:[#allocation6] sm:$0xff]  ;;  %vm97_vm0 = vcmask 261120   ;;  %v407_v14 = vmov 0   ;;  %v214_v29 = vlaneseq }
  0x12   :  { %v288_v2 = vld [vmem:[#allocation8 + $0x38] sm:$0xff]  ;;  %107 = vmatpush.bf16.msra.mxu0 %v280_v1  ;;  %v75_v4 = vld [vmem:[#allocation3] sm:$0xff]  ;;  %v287_v5 = vld [vmem:[#allocation8 + $0x30] sm:$0xff]  ;;  %296 = vset.pattern.permute.xlu0 %v407_v14  ;;  %vm218_vm1 = vcmask 57344  }
  0x13   :  { %184 = vmatpush.bf16.msra.mxu1 %v288_v2  ;;  %v76_v6 = vpack.c.bf16 %v75_v4, %v75_v4  ;;  %v286_v7 = vld [vmem:[#allocation8 + $0x28] sm:$0xff]  ;;  %v285_v8 = vld [vmem:[#allocation8 + $0x20] sm:$0xff]  ;;  %v284_v9 = vld [vmem:[#allocation8 + $0x18] sm:$0xff]  ;;  %v215_v31 = vand.u32 127, %v214_v29 }
  0x14   :  { %v283_v10 = vld [vmem:[#allocation8 + $0x10] sm:$0xff]  ;;  %v282_v11 = vld [vmem:[#allocation8 + $0x8] sm:$0xff]  ;;  %v281_v12 = vld [vmem:[#allocation8] sm:$0xff] }
  0x15   :  { %v205_v13 = vld [vmem:[#allocation2] sm:$0x1] }
  0x16   :  { %108 = vmatpush.bf16.msra.mxu0 %v279_v3  ;;  %208 = vperm.xlu0 %296, %v205_v13   ;;  %v297_v15 = vld [vmem:[%s475_s2] ss:$0 sm:$0xff]  ;;  %s408_s2 = smov [#allocation9]  }
  0x17   :  { %185 = vmatpush.bf16.msra.mxu1 %v287_v5  ;;  %v298_v21 = vld [vmem:[%s477_s4] ss:$0 sm:$0xff]  ;;  %s225_s22 = sshll.u32 %s408_s2, 4  ;;  %s227_s4 = sshll.u32 %s480_s7, 4  ;;  %s226_s22 = int_to_ptr.vmem [resolvable:$true] %s225_s22  ;;  %s228_s4 = int_to_ptr.hbm [resolvable:$true] %s227_s4 }
  0x18   :  { %v299_v24 = vld [vmem:[%s478_s5] ss:$0 sm:$0xff] }
  0x19   :  { %246 = vmatmul.msk.bf16.vlgmr.msra.gmra.mxu0 %vm97_vm0, %v76_v6 }
  0x1b   :  { %186 = vmatpush.bf16.msra.mxu1 %v286_v7 }
  0x1f   :  { %187 = vmatpush.bf16.msra.mxu1 %v285_v8 }
  0x23   :  { %188 = vmatpush.bf16.msra.mxu1 %v284_v9 }
  0x27   :  { %189 = vmatpush.bf16.msra.mxu1 %v283_v10 }
  0x2b   :  { %190 = vmatpush.bf16.msra.mxu1 %v282_v11 }
  0x2f   :  { %191 = vmatpush.bf16.msra.mxu1 %v281_v12 }
  0x88   :  { %v209_v28 = vpop.permute.xlu0 %208 }
  0x89   :  { %v211_v30 = vperm.slane %v209_v28, 0 }
  0x96   :  { %v110_v16 = vpop.f32.mrf.mxu0 }
  0x97   :  { %v111_v17 = vadd.f32 %v297_v15, %v110_v16 }
  0x99   :  { %v114_v18 = vmax.f32 %v111_v17, 0.0 }
  0x9b   :  { %v115_v19 = vpack.c.bf16 %v114_v18, %v114_v18 }
  0x9d   :  { %192 = vmatmul.bf16.vlgmr.msra.gmra.mxu1 %v115_v19 }
  0x9e   :  { %v112_v20 = vpop.f32.mrf.mxu0 }
 0x11a   :  { %v193_v22 = vpop.f32.mrf.mxu1 }
 0x11b   :  { %v194_v23 = vadd.f32 %v298_v21, %v193_v22 }
 0x11d   :  { %v197_v25 = vmax.f32 %v194_v23, 0.0 }
 0x11f   :  { %v202_v26 = vmul.f32 %v299_v24, %v197_v25 }
 0x121   :  { %203 = vadd.xlane.f32.xlu0 %v202_v26 }
 0x122   :  { %v195_v27 = vpop.f32.mrf.mxu1 }
 0x194   :  { %v204_v32 = vpop.xlane.xlu0 %203 }
 0x195   :  { %v212_v33 = vadd.f32 %v211_v30, %v204_v32 }
 0x197   :  { %v216_v34 = vperm.slane %v212_v33, %v215_v31 }
 0x199   :  { %219 = vst.msk [vmem:[#allocation9] sm:$0x1] %vm218_vm1, %v216_v34 }
 0x19a   :  { %230 = dma.vmem_to_hbm [thread:$0]  %s226_s22, 16, %s228_s4, [#allocation5]  }
 0x19b   :  { %400 = dma.done.wait [#allocation5], 16  }
 0x19c   :  { %401 = vsyncadd [#allocation5], 4294967280 }
 0x19d   :  { %235 = vsyncpa [#allocation4], 1 }
 0x19e   :  { %236 = vsyncpa [#allocation7], 1 }
 0x19f   :  { %237 = vsyncpa [#allocation5], 1 }

</bundles_post_ra>
